<compile_context>
chip_gen: v7x
topology: tpu7x:2x2x1
jax: 0.10.0
libtpu: 0.0.40
codegen_flags: <defaults>
</compile_context>

<pallas_src>
import functools
import math

import jax
import jax.numpy as jnp
from jax.experimental import pallas as pl
from jax.experimental.pallas import tpu as pltpu

_LEAKY_SLOPE = 0.2
_GN_EPS = 1e-5
_MXU_DTYPE = jnp.bfloat16  # matmul-operand dtype; accumulation stays f32
_LANE = 128


def _round_up(x, m):
    return (x + m - 1) // m * m


def _leaky_relu(x):
    # For slope in (0, 1): max(x, slope*x) == LeakyReLU(slope)(x). One VALU op.
    return jnp.maximum(x, _LEAKY_SLOPE * x)


# ----------------------------------------------------------------------------
# Kernel
# ----------------------------------------------------------------------------
def _make_pinn_kernel(n_trunk, width, width_p):
    """Kernel over one (TB, ...) batch tile.

    Ref order: x, [trunk weight] * n_trunk, w1_heads, w2_heads, vec_table, out.
    vec_table rows: 0..n_trunk-1 trunk biases, n_trunk b1h, n_trunk+1 gamma,
                    n_trunk+2 beta, n_trunk+3 b2h (all zero-padded to F_max).
    """
    n_w = n_trunk + 2
    two_wp = 2 * width_p
    inv_w = 1.0 / float(width)

    def kernel(x_ref, *refs):
        weights = refs[:n_w]
        vecs_ref = refs[n_w]
        out_ref = refs[n_w + 1]

        vecs = vecs_ref[...]          # f32 [n_vec, F_max] (tiny, VMEM resident)
        h = x_ref[...]                # f32 [TB, in_dim_p]

        # ---- trunk ("self.pinn") ------------------------------------------
        # First Linear has no activation; the rest are Linear -> LeakyReLU(0.2).
        # Dropout(0.2) is identity in eval mode.
        for li in range(n_trunk):
            w = weights[li][...]                       # bf16 [in_p, out_p]
            h = jnp.dot(h.astype(w.dtype), w,
                        preferred_element_type=jnp.float32)
            h = h + vecs[li:li + 1, :h.shape[-1]]      # lane-aligned slice
            if li > 0:
                h = _leaky_relu(h)

        # ---- both heads' first Linear, fused into one MXU matmul -----------
        w1h = weights[n_trunk][...]                    # bf16 [hidden_p, 2*width_p]
        y = jnp.dot(h.astype(w1h.dtype), w1h,
                    preferred_element_type=jnp.float32)
        y = y + vecs[n_trunk:n_trunk + 1, :two_wp]
        y = _leaky_relu(y)                             # f32 [TB, 2*width_p]

        # ---- GroupNorm(1, width) per head, layout-preserving ---------------
        # Padded columns of y are exactly zero (zero weights / biases), so the
        # masked sums below equal sums over the real channels only.
        col = jax.lax.broadcasted_iota(jnp.int32, y.shape, 1)
        is_h0 = col < width_p                          # head-0 lanes
        valid = (col < width) | ((col >= width_p) & (col < width_p + width))

        sum0 = jnp.sum(jnp.where(is_h0, y, 0.0), axis=-1, keepdims=True)
        sum1 = jnp.sum(jnp.where(is_h0, 0.0, y), axis=-1, keepdims=True)
        mu = jnp.where(is_h0, sum0 * inv_w, sum1 * inv_w)

        c = jnp.where(valid, y - mu, 0.0)              # zero on pad lanes
        csq = c * c
        v0 = jnp.sum(jnp.where(is_h0, csq, 0.0), axis=-1, keepdims=True)
        v1 = jnp.sum(jnp.where(is_h0, 0.0, csq), axis=-1, keepdims=True)
        var = jnp.where(is_h0, v0 * inv_w, v1 * inv_w)

        gamma = vecs[n_trunk + 1:n_trunk + 2, :two_wp]
        beta = vecs[n_trunk + 2:n_trunk + 3, :two_wp]
        yn = c * jax.lax.rsqrt(var + _GN_EPS) * gamma + beta
        # Dropout(0.2) == identity in eval mode.

        # ---- both heads' second Linear via block-diagonal weights + Tanh ---
        w2h = weights[n_trunk + 1][...]                # bf16 [2*width_p, d_total_p]
        z = jnp.dot(yn.astype(w2h.dtype), w2h,
                    preferred_element_type=jnp.float32)
        z = z + vecs[n_trunk + 3:n_trunk + 4, :z.shape[-1]]
        out_ref[...] = jnp.tanh(z)                     # lane-dense full store

    return kernel


# ----------------------------------------------------------------------------
# Parameter construction / packing
# ----------------------------------------------------------------------------
def _linear_params(key, fan_in, fan_out):
    """PyTorch nn.Linear-style init (uniform +/- 1/sqrt(fan_in)); weight as [in, out]."""
    kw, kb = jax.random.split(key)
    bound = 1.0 / math.sqrt(fan_in)
    w = jax.random.uniform(kw, (fan_in, fan_out), jnp.float32, -bound, bound)
    b = jax.random.uniform(kb, (1, fan_out), jnp.float32, -bound, bound)
    return w, b


def init_pinn_params(key, pinn_filter, latent_dim_end, input_shape, latent_dim, size2):
    """Raw (unfused, unpadded) parameters mirroring the PyTorch module."""
    num_pf = len(pinn_filter)
    n_trunk = num_pf - 1
    keys = jax.random.split(key, n_trunk + 4)

    trunk = []
    dims = [input_shape] + list(pinn_filter[:-1])
    for li in range(n_trunk):
        trunk.append(_linear_params(keys[li], dims[li], dims[li + 1]))

    hidden = pinn_filter[-2]
    width = pinn_filter[-1]

    def head(k1, k2, out_dim):
        w1, b1 = _linear_params(k1, hidden, width)
        gamma = jnp.ones((1, width), jnp.float32)
        beta = jnp.zeros((1, width), jnp.float32)
        w2, b2 = _linear_params(k2, width, out_dim)
        return dict(w1=w1, b1=b1, gamma=gamma, beta=beta, w2=w2, b2=b2)

    latent_head = head(keys[n_trunk], keys[n_trunk + 1], latent_dim_end)
    xs_head = head(keys[n_trunk + 2], keys[n_trunk + 3], latent_dim * size2)
    return dict(trunk=trunk, latent=latent_head, xs=xs_head)


def pack_pinn_params(raw, mxu_dtype=_MXU_DTYPE):
    """Pack raw params into lane-128-padded kernel operands.

    Returns (packed, meta):
      packed = (trunk_w0..trunk_w{n-1}, w1h, w2h, vec_table)
      meta   = static dims for the wrapper / kernel factory.
    """
    trunk = raw["trunk"]
    n_trunk = len(trunk)
    lat, xs = raw["latent"], raw["xs"]

    hidden, width = lat["w1"].shape
    d_lat = lat["w2"].shape[1]
    d_xs = xs["w2"].shape[1]
    in_dim = trunk[0][0].shape[0]

    width_p = _round_up(width, _LANE)
    d_total = d_lat + d_xs
    d_total_p = _round_up(d_total, _LANE)
    in_dim_p = _round_up(in_dim, _LANE)

    weights = []
    vec_rows = []

    # Trunk: pad every [in, out] weight to [in_p, out_p]; biases to [out_p].
    prev_p = in_dim_p
    for (w, b) in trunk:
        fi, fo = w.shape
        fo_p = _round_up(fo, _LANE)
        wp = jnp.zeros((prev_p, fo_p), jnp.float32).at[:fi, :fo].set(w)
        weights.append(wp.astype(mxu_dtype))
        vec_rows.append(jnp.zeros((fo_p,), jnp.float32).at[:fo].set(b[0]))
        prev_p = fo_p
    hidden_p = prev_p

    # Fused first head layer: [hidden_p, 2*width_p]; head0 at cols [0:width],
    # head1 at cols [width_p : width_p+width].
    w1h = jnp.zeros((hidden_p, 2 * width_p), jnp.float32)
    w1h = (w1h.at[:hidden, :width].set(lat["w1"])
              .at[:hidden, width_p:width_p + width].set(xs["w1"]))
    weights.append(w1h.astype(mxu_dtype))

    def two_head_vec(a, b_):
        v = jnp.zeros((2 * width_p,), jnp.float32)
        return v.at[:width].set(a[0]).at[width_p:width_p + width].set(b_[0])

    b1h = two_head_vec(lat["b1"], xs["b1"])
    gamma = two_head_vec(lat["gamma"], xs["gamma"])
    beta = two_head_vec(lat["beta"], xs["beta"])

    # Fused second head layer: block-diagonal [2*width_p, d_total_p].
    w2h = jnp.zeros((2 * width_p, d_total_p), jnp.float32)
    w2h = (w2h.at[:width, :d_lat].set(lat["w2"])
              .at[width_p:width_p + width, d_lat:d_lat + d_xs].set(xs["w2"]))
    weights.append(w2h.astype(mxu_dtype))
    b2h = (jnp.zeros((d_total_p,), jnp.float32)
              .at[:d_lat].set(lat["b2"][0])
              .at[d_lat:d_lat + d_xs].set(xs["b2"][0]))

    vec_rows += [b1h, gamma, beta, b2h]

    # Single stacked vector table: one operand instead of 2*n_trunk+6.
    f_max = max(int(v.shape[0]) for v in vec_rows)
    vecs = jnp.zeros((len(vec_rows), f_max), jnp.float32)
    for r, v in enumerate(vec_rows):
        vecs = vecs.at[r, :v.shape[0]].set(v)

    packed = tuple(weights) + (vecs,)
    meta = dict(n_trunk=n_trunk, width=width, width_p=width_p,
                in_dim_p=in_dim_p, d_lat=d_lat, d_xs=d_xs, d_total_p=d_total_p)
    return packed, meta


# ----------------------------------------------------------------------------
# Pallas wrapper
# ----------------------------------------------------------------------------
def _plan_batch(batch, tb_max=512):
    """Pick (batch_tile, padded_batch).

    The batch is zero-padded to a multiple of the tile (never degrade to tiny
    tiles for awkward batch sizes), and the tile is capped near B/2 so the
    grid has >= 2 steps whenever the batch allows (v7x: two TensorCores).
    """
    b8 = _round_up(batch, 8)
    if b8 <= 8:
        tb = 8
    else:
        tb = min(tb_max, _round_up(-(-b8 // 2), 8))
    b_pad = _round_up(b8, tb)
    return tb, b_pad


@functools.partial(jax.jit, static_argnames=(
    "n_trunk", "width", "width_p", "in_dim_p", "d_lat", "d_xs", "d_total_p",
    "latent_dim", "size2"))
def pinn_forward(x, packed, *, n_trunk, width, width_p, in_dim_p,
                 d_lat, d_xs, d_total_p, latent_dim, size2):
    B, in_dim = x.shape
    tb, b_pad = _plan_batch(B)
    grid = (b_pad // tb,)

    # Zero-pad the batch and input features (exact: padded rows are discarded,
    # padded feature columns multiply zero weight rows).
    if (b_pad, in_dim_p) != (B, in_dim):
        x = jnp.zeros((b_pad, in_dim_p), x.dtype).at[:B, :in_dim].set(x)

    weights = packed[:-1]
    vecs = packed[-1]
    kernel = _make_pinn_kernel(n_trunk, width, width_p)

    in_specs = [pl.BlockSpec((tb, in_dim_p), lambda i: (i, 0))]
    # Grid-invariant (VMEM-resident) parameter blocks: full array, constant index.
    in_specs += [pl.BlockSpec(w.shape, lambda i: (0, 0)) for w in weights]
    in_specs += [pl.BlockSpec(vecs.shape, lambda i: (0, 0))]
    out_specs = pl.BlockSpec((tb, d_total_p), lambda i: (i, 0))

    # Explicit VMEM budget: double-buffered x/out tiles + (double-buffered)
    # params with headroom; keeps wide configs inside v5e's 16 MiB default and
    # v7x's 32 MiB default / 64 MiB physical VMEM.
    param_bytes = sum(int(p.size) * p.dtype.itemsize for p in packed)
    io_tile_bytes = tb * (in_dim_p + d_total_p) * 4
    vmem_needed = 2 * (param_bytes + io_tile_bytes)
    vmem_limit = int(min(max(2 * vmem_needed + (4 << 20), 32 << 20), 48 << 20))

    # Advisory cost estimate (reflects actual padded MXU work).
    flops = sum(2 * b_pad * int(w.shape[0]) * int(w.shape[1]) for w in weights)
    bytes_accessed = int(b_pad * in_dim_p * 4 + param_bytes + b_pad * d_total_p * 4)
    transcendentals = int(b_pad * d_total_p + 2 * b_pad)  # tanh + 2 rsqrt per row

    out = pl.pallas_call(
        kernel,
        out_shape=jax.ShapeDtypeStruct((b_pad, d_total_p), jnp.float32),
        grid=grid,
        in_specs=in_specs,
        out_specs=out_specs,
        compiler_params=pltpu.CompilerParams(
            dimension_semantics=("parallel",),
            vmem_limit_bytes=vmem_limit),
        cost_estimate=pl.CostEstimate(flops=flops,
                                      transcendentals=transcendentals,
                                      bytes_accessed=bytes_accessed),
    )(x, *weights, vecs)

    latent_out = out[:B, :d_lat]
    # nn.Unflatten(1, (size2, latent_dim)) + Tanh (tanh commutes with reshape).
    xs_out = out[:B, d_lat:d_lat + d_xs].reshape(B, size2, latent_dim)
    return latent_out, xs_out


# ----------------------------------------------------------------------------
# Pure-JAX reference (unfused, unpadded) mirroring the kernel's bf16-matmul math.
# ----------------------------------------------------------------------------
def pinn_reference(x, raw, *, latent_dim, size2, mxu_dtype=_MXU_DTYPE):
    h = x
    for li, (w, b) in enumerate(raw["trunk"]):
        h = jnp.dot(h.astype(mxu_dtype), w.astype(mxu_dtype),
                    preferred_element_type=jnp.float32) + b
        if li > 0:
            h = _leaky_relu(h)

    def head(p):
        y = jnp.dot(h.astype(mxu_dtype), p["w1"].astype(mxu_dtype),
                    preferred_element_type=jnp.float32) + p["b1"]
        y = _leaky_relu(y)
        mu = jnp.mean(y, axis=-1, keepdims=True)
        var = jnp.mean((y - mu) * (y - mu), axis=-1, keepdims=True)
        y = (y - mu) * jax.lax.rsqrt(var + _GN_EPS)
        y = y * p["gamma"] + p["beta"]
        z = jnp.dot(y.astype(mxu_dtype), p["w2"].astype(mxu_dtype),
                    preferred_element_type=jnp.float32) + p["b2"]
        return jnp.tanh(z)

    latent = head(raw["latent"])
    xs = head(raw["xs"]).reshape(x.shape[0], size2, latent_dim)
    return latent, xs


if __name__ == "__main__":
    # Small, deterministic configuration consistent with the module's __init__.
    pinn_filter = [32, 32, 32]   # trunk: in->32, 32->32 ; heads: 32->32->out
    latent_dim_end = 8
    input_shape = 16
    latent_dim = 4
    size2 = 8
    batch = 24                   # non-power-of-two: exercises batch padding + 2-step grid

    key = jax.random.PRNGKey(0)
    kx, kp = jax.random.split(key)

    x = jax.random.normal(kx, (batch, input_shape), jnp.float32)
    raw = init_pinn_params(kp, pinn_filter, latent_dim_end, input_shape,
                           latent_dim, size2)
    packed, meta = pack_pinn_params(raw)

    latent_out, xs_out = pinn_forward(
        x, packed,
        n_trunk=meta["n_trunk"], width=meta["width"], width_p=meta["width_p"],
        in_dim_p=meta["in_dim_p"], d_lat=meta["d_lat"], d_xs=meta["d_xs"],
        d_total_p=meta["d_total_p"], latent_dim=latent_dim, size2=size2,
    )
    jax.block_until_ready((latent_out, xs_out))

    assert latent_out.shape == (batch, latent_dim_end)
    assert xs_out.shape == (batch, size2, latent_dim)
    assert bool(jnp.all(jnp.isfinite(latent_out))) and bool(jnp.all(jnp.isfinite(xs_out)))
    # Tanh outputs must lie in [-1, 1]
    assert bool(jnp.all(jnp.abs(latent_out) <= 1.0)) and bool(jnp.all(jnp.abs(xs_out) <= 1.0))

    # Validate against the unfused, unpadded pure-JAX reference.
    ref_latent, ref_xs = pinn_reference(x, raw, latent_dim=latent_dim, size2=size2)
    assert bool(jnp.allclose(latent_out, ref_latent, atol=5e-3, rtol=5e-3))
    assert bool(jnp.allclose(xs_out, ref_xs, atol=5e-3, rtol=5e-3))

    print("KERNEL_OK")
</pallas_src>

<mosaic_0001>
module attributes {stable_mosaic.version = 11 : i64} {
  func.func @kernel(%arg0: i32, %arg1: memref<16x128xf32, #tpu.memory_space<vmem>>, %arg2: memref<128x128xbf16, #tpu.memory_space<vmem>>, %arg3: memref<128x128xbf16, #tpu.memory_space<vmem>>, %arg4: memref<128x256xbf16, #tpu.memory_space<vmem>>, %arg5: memref<256x128xbf16, #tpu.memory_space<vmem>>, %arg6: memref<6x256xf32, #tpu.memory_space<vmem>>, %arg7: memref<16x128xf32, #tpu.memory_space<vmem>>) attributes {dimension_semantics = [#tpu.dimension_semantics<parallel>], iteration_bounds = array<i64: 2>, scalar_prefetch = 0 : i64, scratch_operands = 0 : i64, tpu.core_type = #tpu.core_type<tc>, window_params = [{transform_indices = @transform_0, window_bounds = array<i64: 16, 128>}, {pipeline_mode = #tpu.pipeline_mode<synchronous>, transform_indices = @transform_1, window_bounds = array<i64: 128, 128>}, {pipeline_mode = #tpu.pipeline_mode<synchronous>, transform_indices = @transform_2, window_bounds = array<i64: 128, 128>}, {pipeline_mode = #tpu.pipeline_mode<synchronous>, transform_indices = @transform_3, window_bounds = array<i64: 128, 256>}, {pipeline_mode = #tpu.pipeline_mode<synchronous>, transform_indices = @transform_4, window_bounds = array<i64: 256, 128>}, {pipeline_mode = #tpu.pipeline_mode<synchronous>, transform_indices = @transform_5, window_bounds = array<i64: 6, 256>}, {transform_indices = @transform_6, window_bounds = array<i64: 16, 128>}]} {
    %c0 = arith.constant 0 : index
    %c0_0 = arith.constant 0 : index
    %0 = vector.load %arg6[%c0, %c0_0] : memref<6x256xf32, #tpu.memory_space<vmem>>, vector<6x256xf32>
    %c0_1 = arith.constant 0 : index
    %c0_2 = arith.constant 0 : index
    %1 = vector.load %arg1[%c0_1, %c0_2] : memref<16x128xf32, #tpu.memory_space<vmem>>, vector<16x128xf32>
    %c0_3 = arith.constant 0 : index
    %c0_4 = arith.constant 0 : index
    %2 = vector.load %arg2[%c0_3, %c0_4] : memref<128x128xbf16, #tpu.memory_space<vmem>>, vector<128x128xbf16>
    %3 = arith.truncf %1 : vector<16x128xf32> to vector<16x128xbf16>
    %cst = arith.constant dense<0.000000e+00> : vector<16x128xf32>
    %4 = tpu.matmul %3, %2, %cst {dimension_numbers = #tpu.dot_dimension_numbers<[1], [0], [0], [1], [0, 0, 1, 1], [], []>} : vector<16x128xbf16>, vector<128x128xbf16>, vector<16x128xf32> -> vector<16x128xf32>
    %5 = vector.extract_strided_slice %0 {offsets = [0, 0], sizes = [1, 128], strides = [1, 1]} : vector<6x256xf32> to vector<1x128xf32>
    %6 = vector.broadcast %5 : vector<1x128xf32> to vector<16x128xf32>
    %7 = arith.addf %4, %6 : vector<16x128xf32>
    %c0_5 = arith.constant 0 : index
    %c0_6 = arith.constant 0 : index
    %8 = vector.load %arg3[%c0_5, %c0_6] : memref<128x128xbf16, #tpu.memory_space<vmem>>, vector<128x128xbf16>
    %9 = arith.truncf %7 : vector<16x128xf32> to vector<16x128xbf16>
    %cst_7 = arith.constant dense<0.000000e+00> : vector<16x128xf32>
    %10 = tpu.matmul %9, %8, %cst_7 {dimension_numbers = #tpu.dot_dimension_numbers<[1], [0], [0], [1], [0, 0, 1, 1], [], []>} : vector<16x128xbf16>, vector<128x128xbf16>, vector<16x128xf32> -> vector<16x128xf32>
    %11 = vector.extract_strided_slice %0 {offsets = [1, 0], sizes = [1, 128], strides = [1, 1]} : vector<6x256xf32> to vector<1x128xf32>
    %12 = vector.broadcast %11 : vector<1x128xf32> to vector<16x128xf32>
    %13 = arith.addf %10, %12 : vector<16x128xf32>
    %cst_8 = arith.constant 2.000000e-01 : f32
    %14 = vector.broadcast %cst_8 : f32 to vector<16x128xf32>
    %15 = arith.mulf %14, %13 : vector<16x128xf32>
    %16 = arith.maximumf %13, %15 : vector<16x128xf32>
    %c0_9 = arith.constant 0 : index
    %c0_10 = arith.constant 0 : index
    %17 = vector.load %arg4[%c0_9, %c0_10] : memref<128x256xbf16, #tpu.memory_space<vmem>>, vector<128x256xbf16>
    %18 = arith.truncf %16 : vector<16x128xf32> to vector<16x128xbf16>
    %cst_11 = arith.constant dense<0.000000e+00> : vector<16x256xf32>
    %19 = tpu.matmul %18, %17, %cst_11 {dimension_numbers = #tpu.dot_dimension_numbers<[1], [0], [0], [1], [0, 0, 1, 1], [], []>} : vector<16x128xbf16>, vector<128x256xbf16>, vector<16x256xf32> -> vector<16x256xf32>
    %20 = vector.extract_strided_slice %0 {offsets = [2, 0], sizes = [1, 256], strides = [1, 1]} : vector<6x256xf32> to vector<1x256xf32>
    %21 = vector.broadcast %20 : vector<1x256xf32> to vector<16x256xf32>
    %22 = arith.addf %19, %21 : vector<16x256xf32>
    %cst_12 = arith.constant 2.000000e-01 : f32
    %23 = vector.broadcast %cst_12 : f32 to vector<16x256xf32>
    %24 = arith.mulf %23, %22 : vector<16x256xf32>
    %25 = arith.maximumf %22, %24 : vector<16x256xf32>
    %26 = tpu.iota {dimensions = array<i32: 1>} : vector<16x256xi32>
    %c128_i32 = arith.constant 128 : i32
    %27 = vector.broadcast %c128_i32 : i32 to vector<16x256xi32>
    %28 = arith.cmpi slt, %26, %27 : vector<16x256xi32>
    %c32_i32 = arith.constant 32 : i32
    %29 = vector.broadcast %c32_i32 : i32 to vector<16x256xi32>
    %30 = arith.cmpi slt, %26, %29 : vector<16x256xi32>
    %c128_i32_13 = arith.constant 128 : i32
    %31 = vector.broadcast %c128_i32_13 : i32 to vector<16x256xi32>
    %32 = arith.cmpi sge, %26, %31 : vector<16x256xi32>
    %c160_i32 = arith.constant 160 : i32
    %33 = vector.broadcast %c160_i32 : i32 to vector<16x256xi32>
    %34 = arith.cmpi slt, %26, %33 : vector<16x256xi32>
    %35 = arith.andi %32, %34 : vector<16x256xi1>
    %36 = arith.ori %30, %35 : vector<16x256xi1>
    %cst_14 = arith.constant 0.000000e+00 : f32
    %37 = vector.broadcast %cst_14 : f32 to vector<16x256xf32>
    %38 = arith.select %28, %25, %37 : vector<16x256xi1>, vector<16x256xf32>
    %cst_15 = arith.constant dense<0.000000e+00> : vector<16xf32>
    %39 = vector.multi_reduction <add>, %38, %cst_15 [1] : vector<16x256xf32> to vector<16xf32>
    %40 = vector.shape_cast %39 : vector<16xf32> to vector<16x1xf32>
    %cst_16 = arith.constant 0.000000e+00 : f32
    %41 = vector.broadcast %cst_16 : f32 to vector<16x256xf32>
    %42 = arith.select %28, %41, %25 : vector<16x256xi1>, vector<16x256xf32>
    %cst_17 = arith.constant dense<0.000000e+00> : vector<16xf32>
    %43 = vector.multi_reduction <add>, %42, %cst_17 [1] : vector<16x256xf32> to vector<16xf32>
    %44 = vector.shape_cast %43 : vector<16xf32> to vector<16x1xf32>
    %cst_18 = arith.constant 3.125000e-02 : f32
    %45 = vector.broadcast %cst_18 : f32 to vector<16x1xf32>
    %46 = arith.mulf %40, %45 : vector<16x1xf32>
    %cst_19 = arith.constant 3.125000e-02 : f32
    %47 = vector.broadcast %cst_19 : f32 to vector<16x1xf32>
    %48 = arith.mulf %44, %47 : vector<16x1xf32>
    %49 = vector.shape_cast %46 : vector<16x1xf32> to vector<16x1xf32>
    %50 = vector.broadcast %49 : vector<16x1xf32> to vector<16x256xf32>
    %51 = vector.shape_cast %48 : vector<16x1xf32> to vector<16x1xf32>
    %52 = vector.broadcast %51 : vector<16x1xf32> to vector<16x256xf32>
    %53 = arith.select %28, %50, %52 : vector<16x256xi1>, vector<16x256xf32>
    %54 = arith.subf %25, %53 : vector<16x256xf32>
    %cst_20 = arith.constant 0.000000e+00 : f32
    %55 = vector.broadcast %cst_20 : f32 to vector<16x256xf32>
    %56 = arith.select %36, %54, %55 : vector<16x256xi1>, vector<16x256xf32>
    %57 = arith.mulf %56, %56 : vector<16x256xf32>
    %cst_21 = arith.constant 0.000000e+00 : f32
    %58 = vector.broadcast %cst_21 : f32 to vector<16x256xf32>
    %59 = arith.select %28, %57, %58 : vector<16x256xi1>, vector<16x256xf32>
    %cst_22 = arith.constant dense<0.000000e+00> : vector<16xf32>
    %60 = vector.multi_reduction <add>, %59, %cst_22 [1] : vector<16x256xf32> to vector<16xf32>
    %61 = vector.shape_cast %60 : vector<16xf32> to vector<16x1xf32>
    %cst_23 = arith.constant 0.000000e+00 : f32
    %62 = vector.broadcast %cst_23 : f32 to vector<16x256xf32>
    %63 = arith.select %28, %62, %57 : vector<16x256xi1>, vector<16x256xf32>
    %cst_24 = arith.constant dense<0.000000e+00> : vector<16xf32>
    %64 = vector.multi_reduction <add>, %63, %cst_24 [1] : vector<16x256xf32> to vector<16xf32>
    %65 = vector.shape_cast %64 : vector<16xf32> to vector<16x1xf32>
    %cst_25 = arith.constant 3.125000e-02 : f32
    %66 = vector.broadcast %cst_25 : f32 to vector<16x1xf32>
    %67 = arith.mulf %61, %66 : vector<16x1xf32>
    %cst_26 = arith.constant 3.125000e-02 : f32
    %68 = vector.broadcast %cst_26 : f32 to vector<16x1xf32>
    %69 = arith.mulf %65, %68 : vector<16x1xf32>
    %70 = vector.shape_cast %67 : vector<16x1xf32> to vector<16x1xf32>
    %71 = vector.broadcast %70 : vector<16x1xf32> to vector<16x256xf32>
    %72 = vector.shape_cast %69 : vector<16x1xf32> to vector<16x1xf32>
    %73 = vector.broadcast %72 : vector<16x1xf32> to vector<16x256xf32>
    %74 = arith.select %28, %71, %73 : vector<16x256xi1>, vector<16x256xf32>
    %75 = vector.extract_strided_slice %0 {offsets = [3, 0], sizes = [1, 256], strides = [1, 1]} : vector<6x256xf32> to vector<1x256xf32>
    %76 = vector.extract_strided_slice %0 {offsets = [4, 0], sizes = [1, 256], strides = [1, 1]} : vector<6x256xf32> to vector<1x256xf32>
    %cst_27 = arith.constant 9.99999974E-6 : f32
    %77 = vector.broadcast %cst_27 : f32 to vector<16x256xf32>
    %78 = arith.addf %74, %77 : vector<16x256xf32>
    %79 = math.rsqrt %78 : vector<16x256xf32>
    %80 = arith.mulf %56, %79 : vector<16x256xf32>
    %81 = vector.broadcast %75 : vector<1x256xf32> to vector<16x256xf32>
    %82 = arith.mulf %80, %81 : vector<16x256xf32>
    %83 = vector.broadcast %76 : vector<1x256xf32> to vector<16x256xf32>
    %84 = arith.addf %82, %83 : vector<16x256xf32>
    %c0_28 = arith.constant 0 : index
    %c0_29 = arith.constant 0 : index
    %85 = vector.load %arg5[%c0_28, %c0_29] : memref<256x128xbf16, #tpu.memory_space<vmem>>, vector<256x128xbf16>
    %86 = arith.truncf %84 : vector<16x256xf32> to vector<16x256xbf16>
    %cst_30 = arith.constant dense<0.000000e+00> : vector<16x128xf32>
    %87 = tpu.matmul %86, %85, %cst_30 {dimension_numbers = #tpu.dot_dimension_numbers<[1], [0], [0], [1], [0, 0, 1, 1], [], []>} : vector<16x256xbf16>, vector<256x128xbf16>, vector<16x128xf32> -> vector<16x128xf32>
    %88 = vector.extract_strided_slice %0 {offsets = [5, 0], sizes = [1, 128], strides = [1, 1]} : vector<6x256xf32> to vector<1x128xf32>
    %89 = vector.broadcast %88 : vector<1x128xf32> to vector<16x128xf32>
    %90 = arith.addf %87, %89 : vector<16x128xf32>
    %91 = math.tanh %90 : vector<16x128xf32>
    %c0_31 = arith.constant 0 : index
    %c0_32 = arith.constant 0 : index
    %92 = vector.load %arg7[%c0_31, %c0_32] : memref<16x128xf32, #tpu.memory_space<vmem>>, vector<16x128xf32>
    tpu.vector_store %arg7[%c0_31, %c0_32], %91 {strides = array<i32>} : memref<16x128xf32, #tpu.memory_space<vmem>>, vector<16x128xf32>,
    return
  }
  func.func @transform_0(%arg0: i32) -> (i32, i32) {
    %c0_i32 = arith.constant 0 : i32
    %c0_i32_0 = arith.constant 0 : i32
    return %arg0, %c0_i32 : i32, i32
  }
  func.func @transform_1(%arg0: i32) -> (i32, i32) {
    %c0_i32 = arith.constant 0 : i32
    %c0_i32_0 = arith.constant 0 : i32
    %c0_i32_1 = arith.constant 0 : i32
    return %c0_i32, %c0_i32_0 : i32, i32
  }
  func.func @transform_2(%arg0: i32) -> (i32, i32) {
    %c0_i32 = arith.constant 0 : i32
    %c0_i32_0 = arith.constant 0 : i32
    %c0_i32_1 = arith.constant 0 : i32
    return %c0_i32, %c0_i32_0 : i32, i32
  }
  func.func @transform_3(%arg0: i32) -> (i32, i32) {
    %c0_i32 = arith.constant 0 : i32
    %c0_i32_0 = arith.constant 0 : i32
    %c0_i32_1 = arith.constant 0 : i32
    return %c0_i32, %c0_i32_0 : i32, i32
  }
  func.func @transform_4(%arg0: i32) -> (i32, i32) {
    %c0_i32 = arith.constant 0 : i32
    %c0_i32_0 = arith.constant 0 : i32
    %c0_i32_1 = arith.constant 0 : i32
    return %c0_i32, %c0_i32_0 : i32, i32
  }
  func.func @transform_5(%arg0: i32) -> (i32, i32) {
    %c0_i32 = arith.constant 0 : i32
    %c0_i32_0 = arith.constant 0 : i32
    %c0_i32_1 = arith.constant 0 : i32
    return %c0_i32, %c0_i32_0 : i32, i32
  }
  func.func @transform_6(%arg0: i32) -> (i32, i32) {
    %c0_i32 = arith.constant 0 : i32
    %c0_i32_0 = arith.constant 0 : i32
    return %arg0, %c0_i32 : i32, i32
  }
}

</mosaic_0001>

<bundles_post_ra>
// kernel: pinn_forward.1
= control target key start
LH: loop header
LB: loop body
LE: loop exit
PB: predicated region body
PF: predicated region fallthrough
CT: control target
= control target key end

     0   :  { %11 = vsyncpa [#allocation3], 0  ;;  %s1675_s0 = inlined_call_operand.vmem [shape: f32[32,128], index: 0, kind: input, shape index: {}]   ;;  %s1676_s1 = inlined_call_operand.vmem [shape: bf16[128,128], index: 1, kind: input, shape index: {}]   ;;  %s1677_s2 = inlined_call_operand.hbm [shape: bf16[128,128], index: 2, kind: input, shape index: {}]   ;;  %s1678_s3 = inlined_call_operand.hbm [shape: bf16[128,256], index: 3, kind: input, shape index: {}]   ;;  %s1679_s4 = inlined_call_operand.hbm [shape: bf16[256,128], index: 4, kind: input, shape index: {}]   ;;  %s1680_s5 = inlined_call_operand.vmem [shape: f32[6,256], index: 5, kind: input, shape index: {}]   ;;  %s1681_s6 = inlined_call_operand.vmem [shape: f32[32,128], index: 6, kind: output, shape index: {}]  }
   0x1   :  { %12 = vsyncpa [#allocation5], 0  ;;  %s1473_s21 = smov 0  }
   0x2 LB: > { %s1428_s22 = smov [#allocation4]   ;;  %s1069_s24 = sadd.s32 4294967295, %s1426_s21   ;;  %s1426_s21 = sphi %s1473_s21, %s18_s21  }
   0x3   : > { %s208_s23 = sshll.u32 %s1428_s22, 4  ;;  %p1071_p0 = scmp.ge.s32.totalorder %s1426_s21, 1  ;;  %s1491_s23 = int_to_ptr.vmem [resolvable:$true] %s208_s23 }
   0x4   : > { %p180_p1 = scmp.lt.s32.totalorder %s1426_s21, 3  ;;  %p1483_p2 = scmp.eq.s32.totalorder %s1069_s24, 0 }
   0x5   : > { %s1429_s27 = smov [#allocation2]   ;;  %s1430_s30 = smov [#allocation6]  }
   0x6   : > { %s1685_s25 = scalar_select %p1483_p2, 1, 0 }
   0x7   : > { %p1487_p3 = pnand %p1071_p0, %p180_p1  ;;  %s195_s28 = sshll.u32 %s1429_s27, 4  ;;  %s1495_s28 = int_to_ptr.vmem [resolvable:$true] %s195_s28 }
   0x8   : > { %s1503_s7 = sshll.u32 %s1430_s30, 4  ;;  %s1328_s10 = scalar_lea.hbm %s1678_s3, 2048  ;;  %s222_s7 = int_to_ptr.vmem [resolvable:$true] %s1503_s7 }
   0x9   : > { %s1686_s26 = scalar_select %p1487_p3, 1, 0 }
   0xa   : > { %p1226_p4 = pneg %p1487_p3  ;;  %p1329_p6 = scmp.ne.s32.totalorder %s1678_s3, %s1328_s10 }
   0xb   : > { %p1335_p10 = scmp.lt.u32.totalorder %s1328_s10, %s1678_s3 }
   0xc   : > { %p1499_p5 = pnand %p1483_p2, %p1226_p4 }
   0xe   : > { %p1513_p7 = pneg %p1499_p5 }
  0x10   : > { %p1331_p8 = pnand %p1513_p7, %p1329_p6 }
  0x12   : > { %p1332_p9 = pneg %p1331_p8 }
  0x14   : > { %p1337_p11 = pnand %p1335_p10, %p1332_p9 }
  0x16   : > { %1340 = shalt.err (!%p1337_p11)
}
  0x17   : > { %s1341_s16 = scalar_lea.vmem %s1491_s23, 2048  ;;  %p1349_p1 = scmp.lt.s32.totalorder %s1491_s23, %s1491_s23 }
  0x18   : > { %p1342_p12 = scmp.ne.s32.totalorder %s1491_s23, %s1341_s16  ;;  %p1350_p4 = scmp.lt.s32.totalorder %s1341_s16, %s1341_s16 }
  0x1a   : > { %p1344_p13 = pnand %p1342_p12, %p1513_p7  ;;  %p1351_p6 = por %p1350_p4, %p1349_p1 }
  0x1c   : > { %p1345_p0 = pneg %p1344_p13 }
  0x1e   : > { %p1352_p8 = pnand %p1351_p6, %p1345_p0 }
  0x20   : > { %1355 = shalt.err (!%p1352_p8)
}
  0x21   : > { %s1431_s17 = smov 128   ;;  %s1432_s18 = smov 8  }
  0x22   : > { %1232 = dma.hbm_to_vmem [thread:$0]  (!%p1499_p5), %s1678_s3, 2048, %s1491_s23, [#allocation5], %s1431_s17, %s1431_s17, %s1432_s18  }
  0x23   : > { %s1356_s30 = scalar_lea.hbm %s1677_s2, 1024 }
  0x24   : > { %p1357_p9 = scmp.ne.s32.totalorder %s1677_s2, %s1356_s30  ;;  %p1363_p12 = scmp.lt.u32.totalorder %s1356_s30, %s1677_s2 }
  0x26   : > { %p1359_p10 = pnand %p1357_p9, %p1513_p7 }
  0x28   : > { %p1360_p11 = pneg %p1359_p10 }
  0x2a   : > { %p1365_p13 = pnand %p1363_p12, %p1360_p11 }
  0x2c   : > { %1368 = shalt.err (!%p1365_p13)
}
  0x2d   : > { %s1369_s23 = scalar_lea.vmem %s1495_s28, 1024  ;;  %p1377_p6 = scmp.lt.s32.totalorder %s1495_s28, %s1495_s28 }
  0x2e   : > { %p1370_p0 = scmp.ne.s32.totalorder %s1495_s28, %s1369_s23  ;;  %p1378_p8 = scmp.lt.s32.totalorder %s1369_s23, %s1369_s23 }
  0x30   : > { %p1372_p1 = pnand %p1370_p0, %p1513_p7  ;;  %p1379_p9 = por %p1378_p8, %p1377_p6 }
  0x32   : > { %p1373_p4 = pneg %p1372_p1 }
  0x34   : > { %p1380_p10 = pnand %p1379_p9, %p1373_p4 }
  0x36   : > { %1383 = shalt.err (!%p1380_p10)
}
  0x37   : > { %s1433_s12 = smov 64   ;;  %s1434_s14 = smov 4  }
  0x38   : > { %1229 = dma.hbm_to_vmem [thread:$0]  (!%p1499_p5), %s1677_s2, 1024, %s1495_s28, [#allocation3], %s1433_s12, %s1433_s12, %s1434_s14  }
  0x39   : > { %s1384_s19 = scalar_lea.hbm %s1679_s4, 2048 }
  0x3a   : > { %p1385_p11 = scmp.ne.s32.totalorder %s1679_s4, %s1384_s19  ;;  %p1391_p0 = scmp.lt.u32.totalorder %s1384_s19, %s1679_s4 }
  0x3c   : > { %p1387_p12 = pnand %p1385_p11, %p1513_p7 }
  0x3e   : > { %p1388_p13 = pneg %p1387_p12 }
  0x40   : > { %p1393_p1 = pnand %p1391_p0, %p1388_p13 }
  0x42   : > { %1396 = shalt.err (!%p1393_p1)
}
  0x43   : > { %s1397_s8 = scalar_lea.vmem %s222_s7, 2048  ;;  %p1405_p9 = scmp.lt.s32.totalorder %s222_s7, %s222_s7 }
  0x44   : > { %p1398_p4 = scmp.ne.s32.totalorder %s222_s7, %s1397_s8  ;;  %p1406_p10 = scmp.lt.s32.totalorder %s1397_s8, %s1397_s8 }
  0x46   : > { %p1400_p6 = pnand %p1398_p4, %p1513_p7  ;;  %p1407_p2 = por %p1406_p10, %p1405_p9 }
  0x48   : > { %p1401_p8 = pneg %p1400_p6 }
  0x4a   : > { %p1408_p3 = pnand %p1407_p2, %p1401_p8 }
  0x4c   : > { %1411 = shalt.err (!%p1408_p3)
}
  0x4d   : > { %1235 = dma.hbm_to_vmem [thread:$0]  (!%p1499_p5), %s1679_s4, 2048, %s222_s7, [#allocation5], %s1433_s12, %s1433_s12, %s1434_s14  }
  0x4e   : > { %p1689_p11 = scmp.ne.s32.totalorder %s1686_s26, 0 }
  0x4f   : > { %p1690_p12 = scmp.ne.s32.totalorder (!%p1689_p11), %s1685_s25, 0 }
  0x50   : > { %249 = sbr.rel (%p1689_p11) target bundleno = 1336 (0x538), region = 44 }
  0x57   : > { %1417 = dma.done.wait (%p1690_p12), [#allocation3], 1024  }
  0x58   : > { %1419 = vsyncadd (%p1690_p12), [#allocation3], 4294966272 }
  0x59   : > { %1421 = dma.done.wait (%p1690_p12), [#allocation5], 4096  }
  0x5a   : > { %1423 = vsyncadd (%p1690_p12), [#allocation5], 4294963200  ;;  %v1435_v0 = vmov 0.0   ;;  %vm1436_vm0 = vmmov 0   ;;  %v1260_v1 = vld [vmem:[%s1676_s1] sm:$0xff]   ;;  %v1261_v2 = vld [vmem:[%s1676_s1 + $0x8] sm:$0xff]   ;;  %v321_v32 = vlaneseq }
  0x5b   : > { %1174 = vmatprep.subr.bf16.mxu0 %v1435_v0  ;;  %1190 = vmatprep.mubr.msk.bf16.mxu0 %vm1436_vm0, %v1435_v0  ;;  %v1262_v3 = vld [vmem:[%s1676_s1 + $0x10] sm:$0xff]   ;;  %s1080_s11 = sshll.u32 %s1069_s24, 1  ;;  %v1268_v4 = vld [vmem:[#allocation2] sm:$0xff]   ;;  %v1263_v5 = vld [vmem:[%s1676_s1 + $0x18] sm:$0xff]   ;;  %v1437_v48 = vmov 0  }
  0x5c   : > { %1194 = vmatprep.subr.bf16.mxu1 %v1435_v0  ;;  %1210 = vmatprep.mubr.msk.bf16.mxu1 %vm1436_vm0, %v1435_v0  ;;  %p288_p2 = scmp.lt.s32.totalorder %s1080_s11, 3  ;;  %v1269_v6 = vld [vmem:[#allocation2 + $0x8] sm:$0xff]   ;;  %v1264_v7 = vld [vmem:[%s1676_s1 + $0x20] sm:$0xff]   ;;  %v1270_v8 = vld [vmem:[#allocation2 + $0x10] sm:$0xff]   ;;  %v1620_v33 = vshrl.u32 %v321_v32, 7 }
  0x5d   : > { %1175 = vmatpush3.bf16.msra.mxu0 %v1260_v1  ;;  %1195 = vmatpush3.bf16.msra.mxu1 %v1268_v4  ;;  %v1265_v9 = vld [vmem:[%s1676_s1 + $0x28] sm:$0xff]   ;;  %v1271_v10 = vld [vmem:[#allocation2 + $0x18] sm:$0xff]   ;;  %v1266_v11 = vld [vmem:[%s1676_s1 + $0x30] sm:$0xff]  }
  0x5e   : > { %1176 = vmatprep.subr.bf16.mxu0 %v1435_v0  ;;  %1196 = vmatprep.subr.bf16.mxu1 %v1435_v0  ;;  %s1692_s11 = smov (!%p288_p2, %s1080_s11), 3  ;;  %v1272_v12 = vld [vmem:[#allocation2 + $0x20] sm:$0xff]   ;;  %v1267_v13 = vld [vmem:[%s1676_s1 + $0x38] sm:$0xff]   ;;  %v1273_v16 = vld [vmem:[#allocation2 + $0x28] sm:$0xff]   ;;  %v323_v34 = vsub.s32 0, %v1620_v33  ;;  %v433_v49 = vsub.s32 1, %v1620_v33 }
  0x5f   : > { %s1081_s17 = sshll.u32 %s1692_s11, 3  ;;  %v1274_v18 = vld [vmem:[#allocation2 + $0x30] sm:$0xff]   ;;  %v1275_v19 = vld [vmem:[#allocation2 + $0x38] sm:$0xff]   ;;  %v1276_v20 = vld [vmem:[#allocation4] ss:$8 sps:$4 sm:$0xff]   ;;  %v547_v62 = vsub.s32 2, %v1620_v33 }
  0x60   : > { %s291_s27 = scalar_lea.vmem %s1675_s0, %s1081_s17  ;;  %v1278_v21 = vld [vmem:[#allocation4 + $0x4] ss:$8 sps:$4 sm:$0xff]   ;;  %v1281_v22 = vld [vmem:[#allocation4 + $0x14] ss:$8 sps:$4 sm:$0xff]   ;;  %v1279_v23 = vld [vmem:[#allocation4 + $0x10] ss:$8 sps:$4 sm:$0xff]   ;;  %s297_s25 = scalar_lea.vmem %s1681_s6, %s1081_s17 }
  0x61   : > { %1177 = vmatpush3.bf16.msra.mxu0 %v1261_v2  ;;  %1197 = vmatpush3.bf16.msra.mxu1 %v1269_v6  ;;  %v302_v14 = vld [vmem:[%s291_s27] sm:$0xff]  ;;  %v303_v15 = vld [vmem:[%s291_s27 + $0x8] sm:$0xff]  ;;  %v1287_v26 = vld [vmem:[#allocation4 + $0x34] ss:$8 sps:$4 sm:$0xff]  }
  0x62   : > { %1178 = vmatprep.subr.bf16.mxu0 %v1435_v0  ;;  %1198 = vmatprep.subr.bf16.mxu1 %v1435_v0  ;;  %v320_v17 = vpack.c.bf16 %v303_v15, %v302_v14  ;;  %v1284_v24 = vld [vmem:[#allocation4 + $0x24] ss:$8 sps:$4 sm:$0xff]   ;;  %v1282_v25 = vld [vmem:[#allocation4 + $0x20] ss:$8 sps:$4 sm:$0xff]   ;;  %v1285_v27 = vld [vmem:[#allocation4 + $0x30] ss:$8 sps:$4 sm:$0xff]  }
  0x63   : > { %v1290_v28 = vld [vmem:[#allocation4 + $0x44] ss:$8 sps:$4 sm:$0xff]   ;;  %v1288_v29 = vld [vmem:[#allocation4 + $0x40] ss:$8 sps:$4 sm:$0xff]   ;;  %v1293_v30 = vld [vmem:[#allocation4 + $0x54] ss:$8 sps:$4 sm:$0xff]  }
  0x64   : > { %v1291_v31 = vld [vmem:[#allocation4 + $0x50] ss:$8 sps:$4 sm:$0xff]   ;;  %v1626_v35 = vld [vmem:[%s1680_s5] sm:$0x3f]  ;;  %v1299_v46 = vld [vmem:[#allocation4 + $0x74] ss:$8 sps:$4 sm:$0xff]  }
  0x65   : > { %1179 = vmatpush3.bf16.msra.mxu0 %v1262_v3  ;;  %1199 = vmatpush3.bf16.msra.mxu1 %v1270_v8  ;;  %v324_v36 = vrot.slane %v1626_v35, %v323_v34  ;;  %v1296_v44 = vld [vmem:[#allocation4 + $0x64] ss:$8 sps:$4 sm:$0xff]   ;;  %v1294_v45 = vld [vmem:[#allocation4 + $0x60] ss:$8 sps:$4 sm:$0xff]   ;;  %v1297_v47 = vld [vmem:[#allocation4 + $0x70] ss:$8 sps:$4 sm:$0xff]   ;;  %v434_v50 = vrot.slane %v1626_v35, %v433_v49 }
  0x66   : > { %1180 = vmatprep.subr.bf16.mxu0 %v1435_v0  ;;  %1200 = vmatprep.subr.bf16.mxu1 %v1435_v0  ;;  %v1635_v63 = vld [vmem:[%s1680_s5 + $0x8] sm:$0x3f]  ;;  %v1307_v49 = vld [vmem:[#allocation6 + $0x18] sm:$0xff]  }
  0x67   : > { %v552_v1 = vrot.slane %v1635_v63, %v547_v62 }
  0x69   : > { %1181 = vmatpush3.bf16.msra.mxu0 %v1263_v5  ;;  %1201 = vmatpush3.bf16.msra.mxu1 %v1271_v10 }
  0x6a   : > { %1182 = vmatprep.subr.bf16.mxu0 %v1435_v0  ;;  %1202 = vmatprep.subr.bf16.mxu1 %v1435_v0 }
  0x6d   : > { %1183 = vmatpush3.bf16.msra.mxu0 %v1264_v7  ;;  %1203 = vmatpush3.bf16.msra.mxu1 %v1272_v12 }
  0x6e   : > { %1184 = vmatprep.subr.bf16.mxu0 %v1435_v0  ;;  %1204 = vmatprep.subr.bf16.mxu1 %v1435_v0 }
  0x71   : > { %1185 = vmatpush3.bf16.msra.mxu0 %v1265_v9  ;;  %1205 = vmatpush3.bf16.msra.mxu1 %v1273_v16 }
  0x72   : > { %1186 = vmatprep.subr.bf16.mxu0 %v1435_v0  ;;  %1206 = vmatprep.subr.bf16.mxu1 %v1435_v0 }
  0x75   : > { %1187 = vmatpush3.bf16.msra.mxu0 %v1266_v11  ;;  %1207 = vmatpush3.bf16.msra.mxu1 %v1274_v18  ;;  %v1300_v18 = vld [vmem:[#allocation6 + $0x40] sm:$0xff]  }
  0x76   : > { %1188 = vmatprep.subr.bf16.mxu0 %v1435_v0  ;;  %1208 = vmatprep.subr.bf16.mxu1 %v1435_v0  ;;  %v548_v0 = vrot.slane %v1626_v35, %v547_v62 }
  0x79   : > { %1189 = vmatpush3.bf16.msra.mxu0 %v1267_v13  ;;  %1209 = vmatpush3.bf16.msra.mxu1 %v1275_v19  ;;  %v685_v19 = vand.u32 127, %v321_v32 }
  0x7a   : > { %633 = vmatprep.subr.bf16.mxu0 %v1278_v21  ;;  %1152 = vmatprep.subr.bf16.mxu1 %v1300_v18 }
  0x7b   : > { %vm689_vm2 = vcmp.lt.s32.totalorder %v685_v19, 32 }
  0x7c   : > { %1191 = vmatmul.mubr.bf16.vlgmr.msra.gmra.mrb[0].mxu0 %v320_v17 }
  0x7d   : > { %634 = vmatpush1.bf16.msra.mxu0 %v1276_v20  ;;  %665 = vmatprep.mubr.bf16.mxu0 %v1437_v48  ;;  %v686_v20 = vadd.s32 128, %v685_v19  ;;  %v1306_v48 = vld [vmem:[#allocation6 + $0x58] sm:$0xff]  }
  0x7e   : > { %635 = vmatprep.subr.bf16.mxu0 %v1281_v22 }
  0x7f   : > { %vm694_vm1 = vcmp.lt.s32.totalorder %v686_v20, 160 }
  0x81   : > { %636 = vmatpush1.bf16.msra.mxu0 %v1279_v23 }
  0x82   : > { %637 = vmatprep.subr.bf16.mxu0 %v1284_v24 }
  0x85   : > { %638 = vmatpush1.bf16.msra.mxu0 %v1282_v25 }
  0x86   : > { %639 = vmatprep.subr.bf16.mxu0 %v1287_v26 }
  0x89   : > { %640 = vmatpush1.bf16.msra.mxu0 %v1285_v27 }
  0x8a   : > { %641 = vmatprep.subr.bf16.mxu0 %v1290_v28 }
  0x8d   : > { %642 = vmatpush1.bf16.msra.mxu0 %v1288_v29 }
  0x8e   : > { %643 = vmatprep.subr.bf16.mxu0 %v1293_v30 }
  0x91   : > { %644 = vmatpush1.bf16.msra.mxu0 %v1291_v31 }
  0x92   : > { %645 = vmatprep.subr.bf16.mxu0 %v1296_v44  ;;  %v1302_v44 = vld [vmem:[#allocation6 + $0x48] sm:$0xff]  }
  0x95   : > { %646 = vmatpush1.bf16.msra.mxu0 %v1294_v45  ;;  %v1303_v45 = vld [vmem:[#allocation6 + $0x8] sm:$0xff]  }
  0x96   : > { %647 = vmatprep.subr.bf16.mxu0 %v1299_v46  ;;  %v1304_v46 = vld [vmem:[#allocation6 + $0x50] sm:$0xff]  }
  0x99   : > { %648 = vmatpush1.bf16.msra.mxu0 %v1297_v47  ;;  %v1305_v47 = vld [vmem:[#allocation6 + $0x10] sm:$0xff]  }
 0x14f   : > { %v407_v37 = vpop.f32.mrb[0].mxu0 }
 0x150   : > { %v1192_v38 = vpop.f32.mrb[1].mxu0  ;;  %v408_v40 = vadd.f32 %v407_v37, %v324_v36 }
 0x151   : > { %v410_v39 = vpop.f32.mrb[2].mxu0 }
 0x152   : > { %v411_v41 = vadd.f32 %v410_v39, %v324_v36  ;;  %v1193_v42 = vpop.f32.mrb[3].mxu0 }
 0x154   : > { %v430_v43 = vpack.c.bf16 %v411_v41, %v408_v40 }
 0x156   : > { %1211 = vmatmul.mubr.bf16.vlgmr.msra.gmra.mrb[0].mxu1 %v430_v43  ;;  %v1301_v43 = vld [vmem:[#allocation6] sm:$0xff]  }
 0x157   : > { %1153 = vmatpush3.bf16.msra.mxu1 %v1301_v43 }
 0x158   : > { %1154 = vmatprep.subr.bf16.mxu1 %v1302_v44 }
 0x15b   : > { %1155 = vmatpush3.bf16.msra.mxu1 %v1303_v45 }
 0x15c   : > { %1156 = vmatprep.subr.bf16.mxu1 %v1304_v46 }
 0x15f   : > { %1157 = vmatpush3.bf16.msra.mxu1 %v1305_v47 }
 0x160   : > { %1158 = vmatprep.subr.bf16.mxu1 %v1306_v48 }
 0x163   : > { %1159 = vmatpush3.bf16.msra.mxu1 %v1307_v49 }
 0x229   : > { %v517_v51 = vpop.f32.mrb[0].mxu1 }
 0x22a   : > { %v518_v52 = vadd.f32 %v517_v51, %v434_v50  ;;  %v1212_v53 = vpop.f32.mrb[1].mxu1  ;;  %v1309_v51 = vld [vmem:[#allocation6 + $0x20] sm:$0xff]  }
 0x22b   : > { %v520_v54 = vpop.f32.mrb[2].mxu1  ;;  %v1311_v53 = vld [vmem:[#allocation6 + $0x28] sm:$0xff]  }
 0x22c   : > { %v524_v55 = vmul.f32 0.2, %v518_v52  ;;  %v521_v56 = vadd.f32 %v520_v54, %v434_v50  ;;  %v1213_v57 = vpop.f32.mrb[3].mxu1  ;;  %v1308_v50 = vld [vmem:[#allocation6 + $0x60] sm:$0xff]   ;;  %v1312_v54 = vld [vmem:[#allocation6 + $0x70] sm:$0xff]  }
 0x22d   : > { %1160 = vmatprep.subr.bf16.mxu1 %v1308_v50  ;;  %v1315_v57 = vld [vmem:[#allocation6 + $0x38] sm:$0xff]  }
 0x22e   : > { %v525_v58 = vmul.f32 0.2, %v521_v56  ;;  %v526_v59 = vmax.f32 %v518_v52, %v524_v55  ;;  %1161 = vmatpush3.bf16.msra.mxu1 %v1309_v51  ;;  %v1310_v52 = vld [vmem:[#allocation6 + $0x68] sm:$0xff]   ;;  %v1313_v55 = vld [vmem:[#allocation6 + $0x30] sm:$0xff]  }
 0x22f   : > { %1162 = vmatprep.subr.bf16.mxu1 %v1310_v52 }
 0x230   : > { %v527_v60 = vmax.f32 %v521_v56, %v525_v58  ;;  %v1314_v56 = vld [vmem:[#allocation6 + $0x78] sm:$0xff]  }
 0x232   : > { %v544_v61 = vpack.c.bf16 %v527_v60, %v526_v59  ;;  %1163 = vmatpush3.bf16.msra.mxu1 %v1311_v53 }
 0x233   : > { %1164 = vmatprep.subr.bf16.mxu1 %v1312_v54 }
 0x234   : > { %666 = vmatmul.mubr.bf16.vlgmr.msra.gmra.mrb[4].mxu0 %v544_v61 }
 0x236   : > { %1165 = vmatpush3.bf16.msra.mxu1 %v1313_v55 }
 0x237   : > { %1166 = vmatprep.subr.bf16.mxu1 %v1314_v56 }
 0x23a   : > { %1167 = vmatpush3.bf16.msra.mxu1 %v1315_v57 }
 0x307   : > { %v667_v2 = vpop.f32.mrb[4].mxu0 }
 0x308   : > { %v668_v3 = vadd.f32 %v667_v2, %v548_v0  ;;  %v669_v4 = vpop.f32.mrb[5].mxu0 }
 0x309   : > { %v670_v5 = vadd.f32 %v669_v4, %v552_v1  ;;  %v671_v6 = vpop.f32.mrb[6].mxu0 }
 0x30a   : > { %v676_v7 = vmul.f32 0.2, %v668_v3  ;;  %v672_v8 = vadd.f32 %v671_v6, %v548_v0  ;;  %v673_v9 = vpop.f32.mrb[7].mxu0 }
 0x30b   : > { %v677_v10 = vmul.f32 0.2, %v670_v5  ;;  %v674_v11 = vadd.f32 %v673_v9, %v552_v1 }
 0x30c   : > { %v678_v12 = vmul.f32 0.2, %v672_v8  ;;  %v680_v13 = vmax.f32 %v668_v3, %v676_v7  ;;  %v781_v7 = vsub.s32 3, %v1620_v33 }
 0x30d   : > { %v679_v14 = vmul.f32 0.2, %v674_v11  ;;  %v681_v15 = vmax.f32 %v670_v5, %v677_v10  ;;  %v793_v10 = vsub.s32 4, %v1620_v33 }
 0x30e   : > { %704 = vadd.xlane.f32.xlu1 %v680_v13  ;;  %v682_v16 = vmax.f32 %v672_v8, %v678_v12  ;;  %v786_v9 = vrot.slane %v1635_v63, %v781_v7 }
 0x30f   : > { %714 = vadd.xlane.f32.xlu0 %v681_v15  ;;  %v683_v17 = vmax.f32 %v674_v11, %v679_v14  ;;  %v782_v14 = vrot.slane %v1626_v35, %v781_v7 }
 0x312   : > { %707 = vadd.xlane.f32.xlu1 %v682_v16 }
 0x313   : > { %717 = vadd.xlane.f32.xlu0 %v683_v17 }
 0x39b   : > { %v705_v21 = vpop.xlane.xlu1 %704 }
 0x39c   : > { %v719_v22 = vmul.f32 0.03125, %v705_v21  ;;  %v715_v23 = vpop.xlane.xlu0 %714  ;;  %v794_v21 = vrot.slane %v1626_v35, %v793_v10 }
 0x39d   : > { %v721_v24 = vmul.f32 0.03125, %v715_v23 }
 0x39e   : > { %v727_v25 = vsub.f32 %v680_v13, %v719_v22 }
 0x39f   : > { %v728_v26 = vsub.f32 %v681_v15, %v721_v24  ;;  %v708_v27 = vpop.xlane.xlu1 %707 }
 0x3a0   : > { %v720_v28 = vmul.f32 0.03125, %v708_v27  ;;  %v718_v29 = vpop.xlane.xlu0 %717  ;;  %v1643_v37 = vsel %vm689_vm2, %v727_v25, 0.0 }
 0x3a1   : > { %v722_v30 = vmul.f32 0.03125, %v718_v29  ;;  %v1639_v31 = vsel %vm694_vm1, %v728_v26, 0.0  ;;  %v735_v40 = vmul.f32 %v1643_v37, %v1643_v37 }
 0x3a2   : > { %v736_v34 = vmul.f32 %v1639_v31, %v1639_v31  ;;  %v729_v36 = vsub.f32 %v682_v16, %v720_v28  ;;  %v798_v16 = vrot.slane %v1635_v63, %v793_v10  ;;  %v839_v63 = vsub.s32 5, %v1620_v33 }
 0x3a3   : > { %v730_v32 = vsub.f32 %v683_v17, %v722_v30 }
 0x3a4   : > { %754 = vadd.xlane.f32.xlu0 %v736_v34  ;;  %v1651_v41 = vsel %vm689_vm2, %v729_v36, 0.0  ;;  %v840_v34 = vrot.slane %v1626_v35, %v839_v63 }
 0x3a5   : > { %v1645_v38 = vsel %vm694_vm1, %v730_v32, 0.0  ;;  %v737_v42 = vmul.f32 %v1651_v41, %v1651_v41 }
 0x3a6   : > { %v738_v39 = vmul.f32 %v1645_v38, %v1645_v38 }
 0x3a8   : > { %757 = vadd.xlane.f32.xlu1 %v738_v39  ;;  %744 = vadd.xlane.f32.xlu0 %v735_v40 }
 0x3ac   : > { %747 = vadd.xlane.f32.xlu1 %v737_v42 }
 0x431   : > { %v755_v58 = vpop.xlane.xlu0 %754 }
 0x432   : > { %v761_v59 = vmul.f32 0.03125, %v755_v58 }
 0x434   : > { %v768_v60 = vadd.f32 1e-05, %v761_v59 }
 0x435   : > { %v745_v61 = vpop.xlane.xlu0 %744  ;;  %v758_v62 = vpop.xlane.xlu1 %757 }
 0x436   : > { %1316 = vrsqrt.f32 %v768_v60  ;;  %v759_v0 = vmul.f32 0.03125, %v745_v61  ;;  %v762_v1 = vmul.f32 0.03125, %v758_v62 }
 0x438   : > { %v767_v2 = vadd.f32 1e-05, %v759_v0  ;;  %v770_v3 = vadd.f32 1e-05, %v762_v1 }
 0x439   : > { %v748_v4 = vpop.xlane.xlu1 %747 }
 0x43a   : > { %1318 = vrsqrt.f32 %v767_v2  ;;  %v760_v5 = vmul.f32 0.03125, %v748_v4 }
 0x43b   : > { %1320 = vrsqrt.f32 %v770_v3 }
 0x43c   : > { %v769_v6 = vadd.f32 1e-05, %v760_v5 }
 0x43e   : > { %1322 = vrsqrt.f32 %v769_v6 }
 0x440   : > { %v1317_v8 = vpop.eup %1316 }
 0x441   : > { %v776_v11 = vmul.f32 %v1317_v8, %v1639_v31 }
 0x443   : > { %v788_v18 = vmul.f32 %v786_v9, %v776_v11 }
 0x444   : > { %v1319_v12 = vpop.eup %1318 }
 0x445   : > { %v1321_v13 = vpop.eup %1320  ;;  %v775_v15 = vmul.f32 %v1319_v12, %v1643_v37  ;;  %v800_v24 = vadd.f32 %v798_v16, %v788_v18 }
 0x446   : > { %v778_v17 = vmul.f32 %v1321_v13, %v1645_v38 }
 0x447   : > { %v787_v23 = vmul.f32 %v782_v14, %v775_v15 }
 0x448   : > { %v1323_v19 = vpop.eup %1322  ;;  %v790_v20 = vmul.f32 %v786_v9, %v778_v17 }
 0x449   : > { %v777_v22 = vmul.f32 %v1323_v19, %v1651_v41  ;;  %v799_v28 = vadd.f32 %v794_v21, %v787_v23 }
 0x44a   : > { %v802_v25 = vadd.f32 %v798_v16, %v790_v20 }
 0x44b   : > { %v789_v26 = vmul.f32 %v782_v14, %v777_v22 }
 0x44c   : > { %v836_v27 = vpack.c.bf16 %v802_v25, %v800_v24 }
 0x44d   : > { %v801_v29 = vadd.f32 %v794_v21, %v789_v26 }
 0x44e   : > { %969 = vmatprep.mubr.bf16.mxu1 %v836_v27 }
 0x44f   : > { %v835_v30 = vpack.c.bf16 %v801_v29, %v799_v28 }
 0x451   : > { %970 = vmatmul.mubr.bf16.vlgmr.msra.gmra.mrb[4].mxu1 %v835_v30 }
 0x524   : > { %v1168_v31 = vpop.f32.mrb[4].mxu1 }
 0x525   : > { %v1169_v36 = vpop.f32.mrb[5].mxu1 }
 0x526   : > { %v1170_v32 = vadd.f32 %v1169_v36, %v1168_v31  ;;  %v1171_v37 = vpop.f32.mrb[6].mxu1 }
 0x527   : > { %v1172_v38 = vpop.f32.mrb[7].mxu1 }
 0x528   : > { %v972_v39 = vadd.f32 %v1170_v32, %v840_v34  ;;  %v1173_v40 = vadd.f32 %v1172_v38, %v1171_v37 }
 0x52a   : > { %1324 = vtanh.f32 %v972_v39  ;;  %v975_v41 = vadd.f32 %v1173_v40, %v840_v34 }
 0x52c   : > { %1326 = vtanh.f32 %v975_v41 }
 0x534   : > { %v1325_v42 = vpop.eup %1324 }
 0x535   : > { %980 = vst [vmem:[%s297_s25] sm:$0xff] %v1325_v42 }
 0x536   : > { %v1327_v33 = vpop.eup %1326 }
 0x537   : > { %981 = vst [vmem:[%s297_s25 + $0x8] sm:$0xff] %v1327_v33 }
 0x538 PF: > { %s18_s21 = sadd.s32 1, %s1426_s21  }
 0x539   : > { %p15_p3 = scmp.ge.s32.totalorder %s18_s21, 4  }
 0x53b   :  { %17 = sbr.rel (!%p15_p3) target bundleno = 2 (0x2), region = 87 }
 0x542   :  { %1004 = vsyncpa [#allocation3], 1 }
 0x543   :  { %1006 = vsyncpa [#allocation3 + $0x1], 1 }
 0x544   :  { %1007 = vsyncpa [#allocation5], 1 }

</bundles_post_ra>
